<compile_context>
chip_gen: v7x
topology: tpu7x:2x2x1
jax: 0.10.0
libtpu: 0.0.40
codegen_flags: <defaults>
</compile_context>

<pallas_src>
import functools

import jax
import jax.numpy as jnp
from jax import lax
from jax.experimental import pallas as pl
from jax.experimental.pallas import tpu as pltpu

_LANE = 128
_SUBLANE = 8


def _round_up(x, m):
    return (x + m - 1) // m * m


def _vmem_limit_bytes():
    """Scoped-VMEM limit to request: ~half of physical, capped at 64 MiB."""
    phys = None
    try:
        phys = int(getattr(pltpu.get_tpu_info(), "vmem_capacity_bytes", 0)) or None
    except Exception:
        phys = None
    if phys is None:
        phys = 64 * 1024 * 1024          # conservative: v7x per-core physical
    # v7x (64 MiB phys) -> 32 MiB scoped; v5e/v6e (128 MiB phys) -> 64 MiB scoped
    return max(32 * 1024 * 1024, min(phys // 2, 64 * 1024 * 1024))


def _padded_table_bytes(rows, dim, itemsize):
    # (8, 128)-tiled VMEM footprint of a resident (rows, dim) table.
    return _round_up(rows, _SUBLANE) * _round_up(dim, _LANE) * itemsize


def _pick_batch_tile(batch, dim, itemsize, scratch_budget):
    """Rows per grid tile: multiple of 8, bounded by scratch bytes, >=2 tiles."""
    lanes = _round_up(dim, _LANE)
    bytes_per_row = 3 * lanes * itemsize          # user + pos + neg gather rows
    max_rows = max(_SUBLANE, scratch_budget // bytes_per_row)
    tile = max(_SUBLANE, (max_rows // _SUBLANE) * _SUBLANE)
    tile = min(tile, 1024)
    # v7x megacore: try to produce at least 2 grid tiles for "parallel" sharding.
    tile = min(tile, _round_up(pl.cdiv(max(batch, 1), 2), _SUBLANE))
    tile = min(tile, _round_up(batch, _SUBLANE))
    return max(tile, _SUBLANE)


# ----------------------------------------------------------------------------
# Shared epilogue: scores -> stable logsigmoid -> masked per-tile partial sum.
# ----------------------------------------------------------------------------
def _bpr_tile_epilogue(ubuf, pbuf, nbuf, out_ref, base, tile_rows, valid_rows):
    u = ubuf[...]
    p = pbuf[...]
    n = nbuf[...]
    if u.dtype != jnp.float32:                     # f32 accumulation regardless
        u = u.astype(jnp.float32)
        p = p.astype(jnp.float32)
        n = n.astype(jnp.float32)

    # Single-pass reduction: sum(u * (p - n)) per row.
    scores = jnp.sum(u * (p - n), axis=1, keepdims=True)            # (tile, 1)

    # Numerically stable logsigmoid(x) = min(x, 0) - log1p(exp(-|x|))
    logsig = jnp.minimum(scores, 0.0) - jnp.log1p(jnp.exp(-jnp.abs(scores)))

    # Mask padded tail rows (they were gathered with id 0) so they add 0.
    rows = base + lax.broadcasted_iota(jnp.int32, (tile_rows, 1), 0)
    partial = jnp.sum(jnp.where(rows < valid_rows, logsig, 0.0))     # scalar

    # Tiny per-tile output block: zeros except [0, 0] = partial sum, so the
    # wrapper can simply sum the whole output array.
    sub = lax.broadcasted_iota(jnp.int32, (_SUBLANE, _LANE), 0)
    lane = lax.broadcasted_iota(jnp.int32, (_SUBLANE, _LANE), 1)
    out_ref[...] = jnp.where((sub == 0) & (lane == 0), partial, 0.0)


# ----------------------------------------------------------------------------
# Fast path: embedding tables resident in VMEM, gather via dynamic row indexing.
# ----------------------------------------------------------------------------
def _bpr_resident_kernel(
    uid_ref, pid_ref, nid_ref,          # SMEM scalar-prefetch: (B_pad,) int32
    user_tbl_ref, item_tbl_ref,         # VMEM-resident embedding tables
    out_ref,                            # VMEM (8, 128) per-tile partial-sum block
    ubuf, pbuf, nbuf,                   # VMEM (tile, D) gather scratch
    *, tile_rows, valid_rows):
    i = pl.program_id(0)
    base = i * tile_rows

    unroll = tile_rows if tile_rows <= 32 else 8

    def gather(r, carry):
        row = base + r
        ubuf[pl.ds(r, 1), :] = user_tbl_ref[pl.ds(uid_ref[row], 1), :]
        pbuf[pl.ds(r, 1), :] = item_tbl_ref[pl.ds(pid_ref[row], 1), :]
        nbuf[pl.ds(r, 1), :] = item_tbl_ref[pl.ds(nid_ref[row], 1), :]
        return carry

    lax.fori_loop(0, tile_rows, gather, 0, unroll=unroll)

    _bpr_tile_epilogue(ubuf, pbuf, nbuf, out_ref, base, tile_rows, valid_rows)


# ----------------------------------------------------------------------------
# Fallback path: tables in HBM, per-row DMA gather, single wait per buffer.
# ----------------------------------------------------------------------------
def _bpr_dma_gather_kernel(
    uid_ref, pid_ref, nid_ref,          # SMEM scalar-prefetch: (B_pad,) int32
    user_tbl_ref, item_tbl_ref,         # HBM (memory_space=pl.ANY) tables
    out_ref,                            # VMEM (8, 128) per-tile partial-sum block
    ubuf, pbuf, nbuf,                   # VMEM (tile, D) gather scratch
    sem,                                # DMA semaphores, shape (3,)
    *, tile_rows, valid_rows):
    i = pl.program_id(0)
    base = i * tile_rows

    def issue(r, carry):
        row = base + r
        pltpu.make_async_copy(user_tbl_ref.at[pl.ds(uid_ref[row], 1)],
                              ubuf.at[pl.ds(r, 1)], sem.at[0]).start()
        pltpu.make_async_copy(item_tbl_ref.at[pl.ds(pid_ref[row], 1)],
                              pbuf.at[pl.ds(r, 1)], sem.at[1]).start()
        pltpu.make_async_copy(item_tbl_ref.at[pl.ds(nid_ref[row], 1)],
                              nbuf.at[pl.ds(r, 1)], sem.at[2]).start()
        return carry

    lax.fori_loop(0, tile_rows, issue, 0, unroll=8)

    # DMA semaphores count bytes: a single descriptor covering the whole
    # (tile, D) buffer retires all `tile` row copies issued on that semaphore.
    # (The src ref is irrelevant for wait(); only the byte count matters.)
    pltpu.make_async_copy(ubuf, ubuf, sem.at[0]).wait()
    pltpu.make_async_copy(pbuf, pbuf, sem.at[1]).wait()
    pltpu.make_async_copy(nbuf, nbuf, sem.at[2]).wait()

    _bpr_tile_epilogue(ubuf, pbuf, nbuf, out_ref, base, tile_rows, valid_rows)


# ----------------------------------------------------------------------------
# Wrapper
# ----------------------------------------------------------------------------
@functools.partial(jax.jit, static_argnames=("batch_tile", "force_dma_gather"))
def bpr_loss_pallas(user_table, item_table, user_id, pos_id, neg_id,
                    *, batch_tile=None, force_dma_gather=False):
    """BPR loss with the embedding gather fused into the Pallas kernel."""
    num_users, dim = user_table.shape
    num_items, dim_i = item_table.shape
    assert dim == dim_i
    assert user_table.dtype == item_table.dtype
    emb_dtype = user_table.dtype
    itemsize = jnp.dtype(emb_dtype).itemsize
    batch = user_id.shape[0]

    vmem_limit = _vmem_limit_bytes()
    scratch_budget = min(8 * 1024 * 1024, vmem_limit // 4)

    tile = (_pick_batch_tile(batch, dim, itemsize, scratch_budget)
            if batch_tile is None else batch_tile)
    assert tile % _SUBLANE == 0 and tile > 0
    num_tiles = pl.cdiv(batch, tile)
    batch_pad = num_tiles * tile

    def prep_ids(ids):
        ids = ids.astype(jnp.int32)
        # Padded rows use id 0 (always valid); they are masked in-kernel.
        return jnp.pad(ids, (0, batch_pad - batch))

    uid = prep_ids(user_id)
    pid = prep_ids(pos_id)
    nid = prep_ids(neg_id)

    lanes = _round_up(dim, _LANE)
    scratch_bytes = 3 * tile * lanes * itemsize
    # x2: pipelined input blocks may be double-buffered even at constant index.
    resident_bytes = 2 * (_padded_table_bytes(num_users, dim, itemsize)
                          + _padded_table_bytes(num_items, dim, itemsize))
    use_resident = (not force_dma_gather) and (
        resident_bytes + scratch_bytes + (2 << 20) <= vmem_limit)

    out_shape = jax.ShapeDtypeStruct((num_tiles * _SUBLANE, _LANE), jnp.float32)
    out_spec = pl.BlockSpec((_SUBLANE, _LANE), lambda i, u, p, n: (i, 0))

    if use_resident:
        kernel = functools.partial(_bpr_resident_kernel,
                                   tile_rows=tile, valid_rows=batch)
        in_specs = [
            pl.BlockSpec((num_users, dim), lambda i, u, p, n: (0, 0)),  # resident
            pl.BlockSpec((num_items, dim), lambda i, u, p, n: (0, 0)),  # resident
        ]
        scratch_shapes = [pltpu.VMEM((tile, dim), emb_dtype) for _ in range(3)]
    else:
        kernel = functools.partial(_bpr_dma_gather_kernel,
                                   tile_rows=tile, valid_rows=batch)
        in_specs = [
            pl.BlockSpec(memory_space=pl.ANY),   # user embedding table (HBM)
            pl.BlockSpec(memory_space=pl.ANY),   # item embedding table (HBM)
        ]
        scratch_shapes = ([pltpu.VMEM((tile, dim), emb_dtype) for _ in range(3)]
                          + [pltpu.SemaphoreType.DMA((3,))])

    grid_spec = pltpu.PrefetchScalarGridSpec(
        num_scalar_prefetch=3,                  # uid / pid / nid -> SMEM
        grid=(num_tiles,),
        in_specs=in_specs,
        out_specs=out_spec,
        scratch_shapes=scratch_shapes,
    )

    per_tile = pl.pallas_call(
        kernel,
        out_shape=out_shape,
        grid_spec=grid_spec,
        compiler_params=pltpu.CompilerParams(
            # Each grid step is self-contained -> shard across v7x TensorCores.
            dimension_semantics=("parallel",),
            vmem_limit_bytes=vmem_limit,
        ),
    )(uid, pid, nid, user_table, item_table)

    # Tiny final reduction: one nonzero scalar per tile, everything else is 0.
    return -jnp.sum(per_tile)


class MatrixFactorizationJAX:
    """Parameter container + forward, mirroring the PyTorch module."""

    def __init__(self, num_users, num_items, dim, key):
        ku, ki = jax.random.split(key)
        # torch.nn.init.normal_(w, 0, 0.01)
        self.user_embeddings = 0.01 * jax.random.normal(
            ku, (num_users, dim), dtype=jnp.float32)
        self.item_embeddings = 0.01 * jax.random.normal(
            ki, (num_items, dim), dtype=jnp.float32)

    def forward(self, user_id, pos_id, neg_id, *, batch_tile=None,
                force_dma_gather=False):
        return bpr_loss_pallas(self.user_embeddings, self.item_embeddings,
                               user_id, pos_id, neg_id,
                               batch_tile=batch_tile,
                               force_dma_gather=force_dma_gather)


def _bpr_loss_ref(user_emb, pos_emb, neg_emb):
    pos_scores = jnp.sum(user_emb * pos_emb, axis=1)
    neg_scores = jnp.sum(user_emb * neg_emb, axis=1)
    return -jnp.sum(jax.nn.log_sigmoid(pos_scores - neg_scores))


if __name__ == "__main__":
    key = jax.random.PRNGKey(0)
    k_model, k_u, k_p, k_n, k_u2, k_p2, k_n2 = jax.random.split(key, 7)

    num_users, num_items, dim, batch = 16, 32, 32, 8
    model = MatrixFactorizationJAX(num_users, num_items, dim, k_model)

    # --- case 1: small batch, resident-table fast path -------------------
    user_id = jax.random.randint(k_u, (batch,), 0, num_users)
    pos_id = jax.random.randint(k_p, (batch,), 0, num_items)
    neg_id = jax.random.randint(k_n, (batch,), 0, num_items)

    loss = jax.block_until_ready(model.forward(user_id, pos_id, neg_id))
    ref = _bpr_loss_ref(model.user_embeddings[user_id],
                        model.item_embeddings[pos_id],
                        model.item_embeddings[neg_id])
    assert jnp.allclose(loss, ref, rtol=1e-5, atol=1e-5), (loss, ref)

    # --- case 2: ragged batch over several tiles (padding + mask + grid) --
    batch2 = 21
    user_id2 = jax.random.randint(k_u2, (batch2,), 0, num_users)
    pos_id2 = jax.random.randint(k_p2, (batch2,), 0, num_items)
    neg_id2 = jax.random.randint(k_n2, (batch2,), 0, num_items)

    loss2 = jax.block_until_ready(
        model.forward(user_id2, pos_id2, neg_id2, batch_tile=8))
    ref2 = _bpr_loss_ref(model.user_embeddings[user_id2],
                         model.item_embeddings[pos_id2],
                         model.item_embeddings[neg_id2])
    assert jnp.allclose(loss2, ref2, rtol=1e-5, atol=1e-5), (loss2, ref2)

    # --- case 3: force the HBM DMA-gather fallback path -------------------
    loss3 = jax.block_until_ready(
        model.forward(user_id, pos_id, neg_id, force_dma_gather=True))
    assert jnp.allclose(loss3, ref, rtol=1e-5, atol=1e-5), (loss3, ref)

    print("KERNEL_OK")
</pallas_src>

<mosaic_0001>
module attributes {stable_mosaic.version = 11 : i64} {
  func.func @_bpr_resident_kernel(%arg0: i32, %arg1: memref<8xi32, #tpu.memory_space<smem>>, %arg2: memref<8xi32, #tpu.memory_space<smem>>, %arg3: memref<8xi32, #tpu.memory_space<smem>>, %arg4: memref<16x32xf32, #tpu.memory_space<vmem>>, %arg5: memref<32x32xf32, #tpu.memory_space<vmem>>, %arg6: memref<8x128xf32, #tpu.memory_space<vmem>>, %arg7: memref<8x32xf32, #tpu.memory_space<vmem>>, %arg8: memref<8x32xf32, #tpu.memory_space<vmem>>, %arg9: memref<8x32xf32, #tpu.memory_space<vmem>>) attributes {dimension_semantics = [#tpu.dimension_semantics<parallel>], iteration_bounds = array<i64: 1>, scalar_prefetch = 3 : i64, scratch_operands = 3 : i64, tpu.core_type = #tpu.core_type<tc>, window_params = [{pipeline_mode = #tpu.pipeline_mode<synchronous>, transform_indices = @transform_0, window_bounds = array<i64: 16, 32>}, {pipeline_mode = #tpu.pipeline_mode<synchronous>, transform_indices = @transform_1, window_bounds = array<i64: 32, 32>}, {transform_indices = @transform_2, window_bounds = array<i64: 8, 128>}]} {
    %c8_i32 = arith.constant 8 : i32
    %0 = arith.muli %arg0, %c8_i32 : i32
    %c0_i32 = arith.constant 0 : i32
    %1 = arith.addi %0, %c0_i32 : i32
    %2 = arith.index_cast %1 : i32 to index
    %3 = memref.load %arg1[%2] : memref<8xi32, #tpu.memory_space<smem>>
    %4 = arith.index_cast %3 : i32 to index
    %c0 = arith.constant 0 : index
    %5 = vector.load %arg4[%4, %c0] : memref<16x32xf32, #tpu.memory_space<vmem>>, vector<1x32xf32>
    %6 = arith.index_cast %c0_i32 : i32 to index
    %c0_0 = arith.constant 0 : index
    %7 = vector.load %arg7[%6, %c0_0] : memref<8x32xf32, #tpu.memory_space<vmem>>, vector<1x32xf32>
    tpu.vector_store %arg7[%6, %c0_0], %5 {strides = array<i32>} : memref<8x32xf32, #tpu.memory_space<vmem>>, vector<1x32xf32>,
    %8 = arith.index_cast %1 : i32 to index
    %9 = memref.load %arg2[%8] : memref<8xi32, #tpu.memory_space<smem>>
    %10 = arith.index_cast %9 : i32 to index
    %c0_1 = arith.constant 0 : index
    %11 = vector.load %arg5[%10, %c0_1] : memref<32x32xf32, #tpu.memory_space<vmem>>, vector<1x32xf32>
    %12 = arith.index_cast %c0_i32 : i32 to index
    %c0_2 = arith.constant 0 : index
    %13 = vector.load %arg8[%12, %c0_2] : memref<8x32xf32, #tpu.memory_space<vmem>>, vector<1x32xf32>
    tpu.vector_store %arg8[%12, %c0_2], %11 {strides = array<i32>} : memref<8x32xf32, #tpu.memory_space<vmem>>, vector<1x32xf32>,
    %14 = arith.index_cast %1 : i32 to index
    %15 = memref.load %arg3[%14] : memref<8xi32, #tpu.memory_space<smem>>
    %16 = arith.index_cast %15 : i32 to index
    %c0_3 = arith.constant 0 : index
    %17 = vector.load %arg5[%16, %c0_3] : memref<32x32xf32, #tpu.memory_space<vmem>>, vector<1x32xf32>
    %18 = arith.index_cast %c0_i32 : i32 to index
    %c0_4 = arith.constant 0 : index
    %19 = vector.load %arg9[%18, %c0_4] : memref<8x32xf32, #tpu.memory_space<vmem>>, vector<1x32xf32>
    tpu.vector_store %arg9[%18, %c0_4], %17 {strides = array<i32>} : memref<8x32xf32, #tpu.memory_space<vmem>>, vector<1x32xf32>,
    %c1_i32 = arith.constant 1 : i32
    %20 = arith.addi %0, %c1_i32 : i32
    %21 = arith.index_cast %20 : i32 to index
    %22 = memref.load %arg1[%21] : memref<8xi32, #tpu.memory_space<smem>>
    %23 = arith.index_cast %22 : i32 to index
    %c0_5 = arith.constant 0 : index
    %24 = vector.load %arg4[%23, %c0_5] : memref<16x32xf32, #tpu.memory_space<vmem>>, vector<1x32xf32>
    %25 = arith.index_cast %c1_i32 : i32 to index
    %c0_6 = arith.constant 0 : index
    %26 = vector.load %arg7[%25, %c0_6] : memref<8x32xf32, #tpu.memory_space<vmem>>, vector<1x32xf32>
    tpu.vector_store %arg7[%25, %c0_6], %24 {strides = array<i32>} : memref<8x32xf32, #tpu.memory_space<vmem>>, vector<1x32xf32>,
    %27 = arith.index_cast %20 : i32 to index
    %28 = memref.load %arg2[%27] : memref<8xi32, #tpu.memory_space<smem>>
    %29 = arith.index_cast %28 : i32 to index
    %c0_7 = arith.constant 0 : index
    %30 = vector.load %arg5[%29, %c0_7] : memref<32x32xf32, #tpu.memory_space<vmem>>, vector<1x32xf32>
    %31 = arith.index_cast %c1_i32 : i32 to index
    %c0_8 = arith.constant 0 : index
    %32 = vector.load %arg8[%31, %c0_8] : memref<8x32xf32, #tpu.memory_space<vmem>>, vector<1x32xf32>
    tpu.vector_store %arg8[%31, %c0_8], %30 {strides = array<i32>} : memref<8x32xf32, #tpu.memory_space<vmem>>, vector<1x32xf32>,
    %33 = arith.index_cast %20 : i32 to index
    %34 = memref.load %arg3[%33] : memref<8xi32, #tpu.memory_space<smem>>
    %35 = arith.index_cast %34 : i32 to index
    %c0_9 = arith.constant 0 : index
    %36 = vector.load %arg5[%35, %c0_9] : memref<32x32xf32, #tpu.memory_space<vmem>>, vector<1x32xf32>
    %37 = arith.index_cast %c1_i32 : i32 to index
    %c0_10 = arith.constant 0 : index
    %38 = vector.load %arg9[%37, %c0_10] : memref<8x32xf32, #tpu.memory_space<vmem>>, vector<1x32xf32>
    tpu.vector_store %arg9[%37, %c0_10], %36 {strides = array<i32>} : memref<8x32xf32, #tpu.memory_space<vmem>>, vector<1x32xf32>,
    %c2_i32 = arith.constant 2 : i32
    %39 = arith.addi %0, %c2_i32 : i32
    %40 = arith.index_cast %39 : i32 to index
    %41 = memref.load %arg1[%40] : memref<8xi32, #tpu.memory_space<smem>>
    %42 = arith.index_cast %41 : i32 to index
    %c0_11 = arith.constant 0 : index
    %43 = vector.load %arg4[%42, %c0_11] : memref<16x32xf32, #tpu.memory_space<vmem>>, vector<1x32xf32>
    %44 = arith.index_cast %c2_i32 : i32 to index
    %c0_12 = arith.constant 0 : index
    %45 = vector.load %arg7[%44, %c0_12] : memref<8x32xf32, #tpu.memory_space<vmem>>, vector<1x32xf32>
    tpu.vector_store %arg7[%44, %c0_12], %43 {strides = array<i32>} : memref<8x32xf32, #tpu.memory_space<vmem>>, vector<1x32xf32>,
    %46 = arith.index_cast %39 : i32 to index
    %47 = memref.load %arg2[%46] : memref<8xi32, #tpu.memory_space<smem>>
    %48 = arith.index_cast %47 : i32 to index
    %c0_13 = arith.constant 0 : index
    %49 = vector.load %arg5[%48, %c0_13] : memref<32x32xf32, #tpu.memory_space<vmem>>, vector<1x32xf32>
    %50 = arith.index_cast %c2_i32 : i32 to index
    %c0_14 = arith.constant 0 : index
    %51 = vector.load %arg8[%50, %c0_14] : memref<8x32xf32, #tpu.memory_space<vmem>>, vector<1x32xf32>
    tpu.vector_store %arg8[%50, %c0_14], %49 {strides = array<i32>} : memref<8x32xf32, #tpu.memory_space<vmem>>, vector<1x32xf32>,
    %52 = arith.index_cast %39 : i32 to index
    %53 = memref.load %arg3[%52] : memref<8xi32, #tpu.memory_space<smem>>
    %54 = arith.index_cast %53 : i32 to index
    %c0_15 = arith.constant 0 : index
    %55 = vector.load %arg5[%54, %c0_15] : memref<32x32xf32, #tpu.memory_space<vmem>>, vector<1x32xf32>
    %56 = arith.index_cast %c2_i32 : i32 to index
    %c0_16 = arith.constant 0 : index
    %57 = vector.load %arg9[%56, %c0_16] : memref<8x32xf32, #tpu.memory_space<vmem>>, vector<1x32xf32>
    tpu.vector_store %arg9[%56, %c0_16], %55 {strides = array<i32>} : memref<8x32xf32, #tpu.memory_space<vmem>>, vector<1x32xf32>,
    %c3_i32 = arith.constant 3 : i32
    %58 = arith.addi %0, %c3_i32 : i32
    %59 = arith.index_cast %58 : i32 to index
    %60 = memref.load %arg1[%59] : memref<8xi32, #tpu.memory_space<smem>>
    %61 = arith.index_cast %60 : i32 to index
    %c0_17 = arith.constant 0 : index
    %62 = vector.load %arg4[%61, %c0_17] : memref<16x32xf32, #tpu.memory_space<vmem>>, vector<1x32xf32>
    %63 = arith.index_cast %c3_i32 : i32 to index
    %c0_18 = arith.constant 0 : index
    %64 = vector.load %arg7[%63, %c0_18] : memref<8x32xf32, #tpu.memory_space<vmem>>, vector<1x32xf32>
    tpu.vector_store %arg7[%63, %c0_18], %62 {strides = array<i32>} : memref<8x32xf32, #tpu.memory_space<vmem>>, vector<1x32xf32>,
    %65 = arith.index_cast %58 : i32 to index
    %66 = memref.load %arg2[%65] : memref<8xi32, #tpu.memory_space<smem>>
    %67 = arith.index_cast %66 : i32 to index
    %c0_19 = arith.constant 0 : index
    %68 = vector.load %arg5[%67, %c0_19] : memref<32x32xf32, #tpu.memory_space<vmem>>, vector<1x32xf32>
    %69 = arith.index_cast %c3_i32 : i32 to index
    %c0_20 = arith.constant 0 : index
    %70 = vector.load %arg8[%69, %c0_20] : memref<8x32xf32, #tpu.memory_space<vmem>>, vector<1x32xf32>
    tpu.vector_store %arg8[%69, %c0_20], %68 {strides = array<i32>} : memref<8x32xf32, #tpu.memory_space<vmem>>, vector<1x32xf32>,
    %71 = arith.index_cast %58 : i32 to index
    %72 = memref.load %arg3[%71] : memref<8xi32, #tpu.memory_space<smem>>
    %73 = arith.index_cast %72 : i32 to index
    %c0_21 = arith.constant 0 : index
    %74 = vector.load %arg5[%73, %c0_21] : memref<32x32xf32, #tpu.memory_space<vmem>>, vector<1x32xf32>
    %75 = arith.index_cast %c3_i32 : i32 to index
    %c0_22 = arith.constant 0 : index
    %76 = vector.load %arg9[%75, %c0_22] : memref<8x32xf32, #tpu.memory_space<vmem>>, vector<1x32xf32>
    tpu.vector_store %arg9[%75, %c0_22], %74 {strides = array<i32>} : memref<8x32xf32, #tpu.memory_space<vmem>>, vector<1x32xf32>,
    %c4_i32 = arith.constant 4 : i32
    %77 = arith.addi %0, %c4_i32 : i32
    %78 = arith.index_cast %77 : i32 to index
    %79 = memref.load %arg1[%78] : memref<8xi32, #tpu.memory_space<smem>>
    %80 = arith.index_cast %79 : i32 to index
    %c0_23 = arith.constant 0 : index
    %81 = vector.load %arg4[%80, %c0_23] : memref<16x32xf32, #tpu.memory_space<vmem>>, vector<1x32xf32>
    %82 = arith.index_cast %c4_i32 : i32 to index
    %c0_24 = arith.constant 0 : index
    %83 = vector.load %arg7[%82, %c0_24] : memref<8x32xf32, #tpu.memory_space<vmem>>, vector<1x32xf32>
    tpu.vector_store %arg7[%82, %c0_24], %81 {strides = array<i32>} : memref<8x32xf32, #tpu.memory_space<vmem>>, vector<1x32xf32>,
    %84 = arith.index_cast %77 : i32 to index
    %85 = memref.load %arg2[%84] : memref<8xi32, #tpu.memory_space<smem>>
    %86 = arith.index_cast %85 : i32 to index
    %c0_25 = arith.constant 0 : index
    %87 = vector.load %arg5[%86, %c0_25] : memref<32x32xf32, #tpu.memory_space<vmem>>, vector<1x32xf32>
    %88 = arith.index_cast %c4_i32 : i32 to index
    %c0_26 = arith.constant 0 : index
    %89 = vector.load %arg8[%88, %c0_26] : memref<8x32xf32, #tpu.memory_space<vmem>>, vector<1x32xf32>
    tpu.vector_store %arg8[%88, %c0_26], %87 {strides = array<i32>} : memref<8x32xf32, #tpu.memory_space<vmem>>, vector<1x32xf32>,
    %90 = arith.index_cast %77 : i32 to index
    %91 = memref.load %arg3[%90] : memref<8xi32, #tpu.memory_space<smem>>
    %92 = arith.index_cast %91 : i32 to index
    %c0_27 = arith.constant 0 : index
    %93 = vector.load %arg5[%92, %c0_27] : memref<32x32xf32, #tpu.memory_space<vmem>>, vector<1x32xf32>
    %94 = arith.index_cast %c4_i32 : i32 to index
    %c0_28 = arith.constant 0 : index
    %95 = vector.load %arg9[%94, %c0_28] : memref<8x32xf32, #tpu.memory_space<vmem>>, vector<1x32xf32>
    tpu.vector_store %arg9[%94, %c0_28], %93 {strides = array<i32>} : memref<8x32xf32, #tpu.memory_space<vmem>>, vector<1x32xf32>,
    %c5_i32 = arith.constant 5 : i32
    %96 = arith.addi %0, %c5_i32 : i32
    %97 = arith.index_cast %96 : i32 to index
    %98 = memref.load %arg1[%97] : memref<8xi32, #tpu.memory_space<smem>>
    %99 = arith.index_cast %98 : i32 to index
    %c0_29 = arith.constant 0 : index
    %100 = vector.load %arg4[%99, %c0_29] : memref<16x32xf32, #tpu.memory_space<vmem>>, vector<1x32xf32>
    %101 = arith.index_cast %c5_i32 : i32 to index
    %c0_30 = arith.constant 0 : index
    %102 = vector.load %arg7[%101, %c0_30] : memref<8x32xf32, #tpu.memory_space<vmem>>, vector<1x32xf32>
    tpu.vector_store %arg7[%101, %c0_30], %100 {strides = array<i32>} : memref<8x32xf32, #tpu.memory_space<vmem>>, vector<1x32xf32>,
    %103 = arith.index_cast %96 : i32 to index
    %104 = memref.load %arg2[%103] : memref<8xi32, #tpu.memory_space<smem>>
    %105 = arith.index_cast %104 : i32 to index
    %c0_31 = arith.constant 0 : index
    %106 = vector.load %arg5[%105, %c0_31] : memref<32x32xf32, #tpu.memory_space<vmem>>, vector<1x32xf32>
    %107 = arith.index_cast %c5_i32 : i32 to index
    %c0_32 = arith.constant 0 : index
    %108 = vector.load %arg8[%107, %c0_32] : memref<8x32xf32, #tpu.memory_space<vmem>>, vector<1x32xf32>
    tpu.vector_store %arg8[%107, %c0_32], %106 {strides = array<i32>} : memref<8x32xf32, #tpu.memory_space<vmem>>, vector<1x32xf32>,
    %109 = arith.index_cast %96 : i32 to index
    %110 = memref.load %arg3[%109] : memref<8xi32, #tpu.memory_space<smem>>
    %111 = arith.index_cast %110 : i32 to index
    %c0_33 = arith.constant 0 : index
    %112 = vector.load %arg5[%111, %c0_33] : memref<32x32xf32, #tpu.memory_space<vmem>>, vector<1x32xf32>
    %113 = arith.index_cast %c5_i32 : i32 to index
    %c0_34 = arith.constant 0 : index
    %114 = vector.load %arg9[%113, %c0_34] : memref<8x32xf32, #tpu.memory_space<vmem>>, vector<1x32xf32>
    tpu.vector_store %arg9[%113, %c0_34], %112 {strides = array<i32>} : memref<8x32xf32, #tpu.memory_space<vmem>>, vector<1x32xf32>,
    %c6_i32 = arith.constant 6 : i32
    %115 = arith.addi %0, %c6_i32 : i32
    %116 = arith.index_cast %115 : i32 to index
    %117 = memref.load %arg1[%116] : memref<8xi32, #tpu.memory_space<smem>>
    %118 = arith.index_cast %117 : i32 to index
    %c0_35 = arith.constant 0 : index
    %119 = vector.load %arg4[%118, %c0_35] : memref<16x32xf32, #tpu.memory_space<vmem>>, vector<1x32xf32>
    %120 = arith.index_cast %c6_i32 : i32 to index
    %c0_36 = arith.constant 0 : index
    %121 = vector.load %arg7[%120, %c0_36] : memref<8x32xf32, #tpu.memory_space<vmem>>, vector<1x32xf32>
    tpu.vector_store %arg7[%120, %c0_36], %119 {strides = array<i32>} : memref<8x32xf32, #tpu.memory_space<vmem>>, vector<1x32xf32>,
    %122 = arith.index_cast %115 : i32 to index
    %123 = memref.load %arg2[%122] : memref<8xi32, #tpu.memory_space<smem>>
    %124 = arith.index_cast %123 : i32 to index
    %c0_37 = arith.constant 0 : index
    %125 = vector.load %arg5[%124, %c0_37] : memref<32x32xf32, #tpu.memory_space<vmem>>, vector<1x32xf32>
    %126 = arith.index_cast %c6_i32 : i32 to index
    %c0_38 = arith.constant 0 : index
    %127 = vector.load %arg8[%126, %c0_38] : memref<8x32xf32, #tpu.memory_space<vmem>>, vector<1x32xf32>
    tpu.vector_store %arg8[%126, %c0_38], %125 {strides = array<i32>} : memref<8x32xf32, #tpu.memory_space<vmem>>, vector<1x32xf32>,
    %128 = arith.index_cast %115 : i32 to index
    %129 = memref.load %arg3[%128] : memref<8xi32, #tpu.memory_space<smem>>
    %130 = arith.index_cast %129 : i32 to index
    %c0_39 = arith.constant 0 : index
    %131 = vector.load %arg5[%130, %c0_39] : memref<32x32xf32, #tpu.memory_space<vmem>>, vector<1x32xf32>
    %132 = arith.index_cast %c6_i32 : i32 to index
    %c0_40 = arith.constant 0 : index
    %133 = vector.load %arg9[%132, %c0_40] : memref<8x32xf32, #tpu.memory_space<vmem>>, vector<1x32xf32>
    tpu.vector_store %arg9[%132, %c0_40], %131 {strides = array<i32>} : memref<8x32xf32, #tpu.memory_space<vmem>>, vector<1x32xf32>,
    %c7_i32 = arith.constant 7 : i32
    %134 = arith.addi %0, %c7_i32 : i32
    %135 = arith.index_cast %134 : i32 to index
    %136 = memref.load %arg1[%135] : memref<8xi32, #tpu.memory_space<smem>>
    %137 = arith.index_cast %136 : i32 to index
    %c0_41 = arith.constant 0 : index
    %138 = vector.load %arg4[%137, %c0_41] : memref<16x32xf32, #tpu.memory_space<vmem>>, vector<1x32xf32>
    %139 = arith.index_cast %c7_i32 : i32 to index
    %c0_42 = arith.constant 0 : index
    %140 = vector.load %arg7[%139, %c0_42] : memref<8x32xf32, #tpu.memory_space<vmem>>, vector<1x32xf32>
    tpu.vector_store %arg7[%139, %c0_42], %138 {strides = array<i32>} : memref<8x32xf32, #tpu.memory_space<vmem>>, vector<1x32xf32>,
    %141 = arith.index_cast %134 : i32 to index
    %142 = memref.load %arg2[%141] : memref<8xi32, #tpu.memory_space<smem>>
    %143 = arith.index_cast %142 : i32 to index
    %c0_43 = arith.constant 0 : index
    %144 = vector.load %arg5[%143, %c0_43] : memref<32x32xf32, #tpu.memory_space<vmem>>, vector<1x32xf32>
    %145 = arith.index_cast %c7_i32 : i32 to index
    %c0_44 = arith.constant 0 : index
    %146 = vector.load %arg8[%145, %c0_44] : memref<8x32xf32, #tpu.memory_space<vmem>>, vector<1x32xf32>
    tpu.vector_store %arg8[%145, %c0_44], %144 {strides = array<i32>} : memref<8x32xf32, #tpu.memory_space<vmem>>, vector<1x32xf32>,
    %147 = arith.index_cast %134 : i32 to index
    %148 = memref.load %arg3[%147] : memref<8xi32, #tpu.memory_space<smem>>
    %149 = arith.index_cast %148 : i32 to index
    %c0_45 = arith.constant 0 : index
    %150 = vector.load %arg5[%149, %c0_45] : memref<32x32xf32, #tpu.memory_space<vmem>>, vector<1x32xf32>
    %151 = arith.index_cast %c7_i32 : i32 to index
    %c0_46 = arith.constant 0 : index
    %152 = vector.load %arg9[%151, %c0_46] : memref<8x32xf32, #tpu.memory_space<vmem>>, vector<1x32xf32>
    tpu.vector_store %arg9[%151, %c0_46], %150 {strides = array<i32>} : memref<8x32xf32, #tpu.memory_space<vmem>>, vector<1x32xf32>,
    %c8_i32_47 = arith.constant 8 : i32
    %c0_48 = arith.constant 0 : index
    %c0_49 = arith.constant 0 : index
    %153 = vector.load %arg7[%c0_48, %c0_49] : memref<8x32xf32, #tpu.memory_space<vmem>>, vector<8x32xf32>
    %c0_50 = arith.constant 0 : index
    %c0_51 = arith.constant 0 : index
    %154 = vector.load %arg8[%c0_50, %c0_51] : memref<8x32xf32, #tpu.memory_space<vmem>>, vector<8x32xf32>
    %c0_52 = arith.constant 0 : index
    %c0_53 = arith.constant 0 : index
    %155 = vector.load %arg9[%c0_52, %c0_53] : memref<8x32xf32, #tpu.memory_space<vmem>>, vector<8x32xf32>
    %156 = arith.subf %154, %155 : vector<8x32xf32>
    %157 = arith.mulf %153, %156 : vector<8x32xf32>
    %cst = arith.constant dense<0.000000e+00> : vector<8xf32>
    %158 = vector.multi_reduction <add>, %157, %cst [1] : vector<8x32xf32> to vector<8xf32>
    %159 = vector.shape_cast %158 : vector<8xf32> to vector<8x1xf32>
    %cst_54 = arith.constant 0.000000e+00 : f32
    %160 = vector.broadcast %cst_54 : f32 to vector<8x1xf32>
    %161 = arith.minimumf %159, %160 : vector<8x1xf32>
    %162 = math.absf %159 : vector<8x1xf32>
    %cst_55 = arith.constant 0.000000e+00 : f32
    %163 = vector.broadcast %cst_55 : f32 to vector<8x1xf32>
    %164 = arith.subf %163, %162 : vector<8x1xf32>
    %165 = math.exp %164 : vector<8x1xf32>
    %166 = math.log1p %165 : vector<8x1xf32>
    %167 = arith.subf %161, %166 : vector<8x1xf32>
    %168 = tpu.iota {dimensions = array<i32: 0>} : vector<8x1xi32>
    %169 = vector.broadcast %0 : i32 to vector<8x1xi32>
    %170 = arith.addi %169, %168 : vector<8x1xi32>
    %c8_i32_56 = arith.constant 8 : i32
    %171 = vector.broadcast %c8_i32_56 : i32 to vector<8x1xi32>
    %172 = arith.cmpi slt, %170, %171 : vector<8x1xi32>
    %cst_57 = arith.constant 0.000000e+00 : f32
    %173 = vector.broadcast %cst_57 : f32 to vector<8x1xf32>
    %174 = arith.select %172, %167, %173 : vector<8x1xi1>, vector<8x1xf32>
    %175 = vector.shape_cast %174 : vector<8x1xf32> to vector<1x8x1xf32>
    %cst_58 = arith.constant dense<0.000000e+00> : vector<1xf32>
    %176 = vector.multi_reduction <add>, %175, %cst_58 [1, 2] : vector<1x8x1xf32> to vector<1xf32>
    %177 = vector.shape_cast %176 : vector<1xf32> to vector<1x1x1xf32>
    %178 = vector.extract %177[0, 0, 0] : f32 from vector<1x1x1xf32>
    %179 = tpu.iota {dimensions = array<i32: 0>} : vector<8x128xi32>
    %180 = tpu.iota {dimensions = array<i32: 1>} : vector<8x128xi32>
    %c0_i32_59 = arith.constant 0 : i32
    %181 = vector.broadcast %c0_i32_59 : i32 to vector<8x128xi32>
    %182 = arith.cmpi eq, %179, %181 : vector<8x128xi32>
    %c0_i32_60 = arith.constant 0 : i32
    %183 = vector.broadcast %c0_i32_60 : i32 to vector<8x128xi32>
    %184 = arith.cmpi eq, %180, %183 : vector<8x128xi32>
    %185 = arith.andi %182, %184 : vector<8x128xi1>
    %cst_61 = arith.constant 0.000000e+00 : f32
    %186 = vector.broadcast %178 : f32 to vector<8x128xf32>
    %187 = vector.broadcast %cst_61 : f32 to vector<8x128xf32>
    %188 = arith.select %185, %186, %187 : vector<8x128xi1>, vector<8x128xf32>
    %c0_62 = arith.constant 0 : index
    %c0_63 = arith.constant 0 : index
    %189 = vector.load %arg6[%c0_62, %c0_63] : memref<8x128xf32, #tpu.memory_space<vmem>>, vector<8x128xf32>
    tpu.vector_store %arg6[%c0_62, %c0_63], %188 {strides = array<i32>} : memref<8x128xf32, #tpu.memory_space<vmem>>, vector<8x128xf32>,
    return
  }
  func.func @transform_0(%arg0: i32, %arg1: memref<8xi32, #tpu.memory_space<smem>>, %arg2: memref<8xi32, #tpu.memory_space<smem>>, %arg3: memref<8xi32, #tpu.memory_space<smem>>) -> (i32, i32) {
    %c0_i32 = arith.constant 0 : i32
    %c0_i32_0 = arith.constant 0 : i32
    %c0_i32_1 = arith.constant 0 : i32
    return %c0_i32, %c0_i32_0 : i32, i32
  }
  func.func @transform_1(%arg0: i32, %arg1: memref<8xi32, #tpu.memory_space<smem>>, %arg2: memref<8xi32, #tpu.memory_space<smem>>, %arg3: memref<8xi32, #tpu.memory_space<smem>>) -> (i32, i32) {
    %c0_i32 = arith.constant 0 : i32
    %c0_i32_0 = arith.constant 0 : i32
    %c0_i32_1 = arith.constant 0 : i32
    return %c0_i32, %c0_i32_0 : i32, i32
  }
  func.func @transform_2(%arg0: i32, %arg1: memref<8xi32, #tpu.memory_space<smem>>, %arg2: memref<8xi32, #tpu.memory_space<smem>>, %arg3: memref<8xi32, #tpu.memory_space<smem>>) -> (i32, i32) {
    %c0_i32 = arith.constant 0 : i32
    %c0_i32_0 = arith.constant 0 : i32
    return %arg0, %c0_i32 : i32, i32
  }
}

</mosaic_0001>

<bundles_post_ra>
// kernel: bpr_loss_pallas.1
= control target key start
LH: loop header
LB: loop body
LE: loop exit
PB: predicated region body
PF: predicated region fallthrough
CT: control target
= control target key end

     0   :  { %s478_s0 = inlined_call_operand.vmem [shape: s32[8], index: 0, kind: input, shape index: {}]   ;;  %s479_s3 = inlined_call_operand.hbm [shape: f32[16,32], index: 3, kind: input, shape index: {}]   ;;  %s480_s4 = inlined_call_operand.hbm [shape: f32[32,32], index: 4, kind: input, shape index: {}]   ;;  %s481_s5 = inlined_call_operand.vmem [shape: f32[8,128], index: 5, kind: output, shape index: {}]   ;;  %s482_s1 = inlined_call_operand.vmem [shape: s32[8], index: 1, kind: input, shape index: {}]   ;;  %s483_s2 = inlined_call_operand.vmem [shape: s32[8], index: 2, kind: input, shape index: {}]  }
   0x1   :  { %s10_s20 = sshll.u32 %s478_s0, 4  ;;  %s14_s23 = sshll.u32 %s482_s1, 4  ;;  %s11_s20 = int_to_ptr.vmem [resolvable:$true] %s10_s20  ;;  %s15_s23 = int_to_ptr.vmem [resolvable:$true] %s14_s23 }
   0x2   :  { %s274_s24 = scalar_lea.vmem %s11_s20, 16  ;;  %p279_p1 = scmp.lt.s32.totalorder %s11_s20, %s11_s20 }
   0x3   :  { %p275_p0 = scmp.ne.s32.totalorder %s11_s20, %s274_s24  ;;  %p280_p2 = scmp.lt.s32.totalorder %s274_s24, %s274_s24 }
   0x5   :  { %p281_p3 = por %p280_p2, %p279_p1 }
   0x7   :  { %p282_p4 = pnand %p281_p3, %p275_p0 }
   0x9   :  { %285 = shalt.err (!%p282_p4)  }
   0xa   :  { %s360_s25 = smov [#allocation6]   ;;  %s286_s26 = scalar_lea.vmem %s15_s23, 16 }
   0xb   :  { %13 = dma.vmem_to_smem %s11_s20, 16, %s360_s25, [#allocation5] }
   0xc   :  { %p287_p5 = scmp.ne.s32.totalorder %s15_s23, %s286_s26  ;;  %p291_p6 = scmp.lt.s32.totalorder %s15_s23, %s15_s23 }
   0xd   :  { %p292_p7 = scmp.lt.s32.totalorder %s286_s26, %s286_s26 }
   0xf   :  { %p293_p8 = por %p292_p7, %p291_p6 }
  0x11   :  { %p294_p9 = pnand %p293_p8, %p287_p5 }
  0x13   :  { %297 = shalt.err (!%p294_p9)  }
  0x14   :  { %s361_s0 = smov [#allocation7]   ;;  %s18_s28 = sshll.u32 %s483_s2, 4  ;;  %s19_s28 = int_to_ptr.vmem [resolvable:$true] %s18_s28 }
  0x15   :  { %17 = dma.vmem_to_smem %s15_s23, 16, %s361_s0, [#allocation5] }
  0x16   :  { %s298_s29 = scalar_lea.vmem %s19_s28, 16  ;;  %p303_p11 = scmp.lt.s32.totalorder %s19_s28, %s19_s28 }
  0x17   :  { %p299_p10 = scmp.ne.s32.totalorder %s19_s28, %s298_s29  ;;  %p304_p12 = scmp.lt.s32.totalorder %s298_s29, %s298_s29 }
  0x19   :  { %p305_p13 = por %p304_p12, %p303_p11 }
  0x1b   :  { %p306_p0 = pnand %p305_p13, %p299_p10 }
  0x1d   :  { %309 = shalt.err (!%p306_p0)  }
  0x1e   :  { %s362_s30 = smov [#allocation8]  }
  0x1f   :  { %21 = dma.vmem_to_smem %s19_s28, 16, %s362_s30, [#allocation5] }
  0x20   :  { %354 = dma.done.wait [#allocation5], 48 }
  0x21   :  { %355 = vsyncadd [#allocation5], 4294967248 }
  0x22   :  { %23 = sfence }
  0x23   :  { %24 = vsyncpa [#allocation10], 0 }
  0x24   :  { %25 = vsyncpa [#allocation12], 0  ;;  %s363_s6 = smov [#allocation9]   ;;  %s310_s9 = scalar_lea.hbm %s479_s3, 256 }
  0x25   :  { %s31_s7 = sshll.u32 %s363_s6, 4  ;;  %p311_p1 = scmp.ne.s32.totalorder %s479_s3, %s310_s9  ;;  %s32_s7 = int_to_ptr.vmem [resolvable:$true] %s31_s7 }
  0x26   :  { %p314_p2 = scmp.lt.u32.totalorder %s310_s9, %s479_s3 }
  0x28   :  { %p316_p3 = pnand %p314_p2, %p311_p1 }
  0x2a   :  { %319 = shalt.err (!%p316_p3)
}
  0x2b   :  { %s320_s14 = scalar_lea.vmem %s32_s7, 256  ;;  %p325_p5 = scmp.lt.s32.totalorder %s32_s7, %s32_s7 }
  0x2c   :  { %p321_p4 = scmp.ne.s32.totalorder %s32_s7, %s320_s14  ;;  %p326_p6 = scmp.lt.s32.totalorder %s320_s14, %s320_s14 }
  0x2e   :  { %p327_p7 = por %p326_p6, %p325_p5 }
  0x30   :  { %p328_p8 = pnand %p327_p7, %p321_p4 }
  0x32   :  { %331 = shalt.err (!%p328_p8)
}
  0x33   :  { %s364_s15 = smov 128   ;;  %s365_s16 = smov 8  }
  0x34   :  { %37 = dma.hbm_to_vmem [thread:$0]  %s479_s3, 256, %s32_s7, [#allocation10], %s364_s15, %s364_s15, %s365_s16  }
  0x35   :  { %s366_s19 = smov [#allocation11]   ;;  %s332_s23 = scalar_lea.hbm %s480_s4, 512 }
  0x36   :  { %s43_s20 = sshll.u32 %s366_s19, 4  ;;  %p333_p9 = scmp.ne.s32.totalorder %s480_s4, %s332_s23  ;;  %s44_s20 = int_to_ptr.vmem [resolvable:$true] %s43_s20 }
  0x37   :  { %p336_p10 = scmp.lt.u32.totalorder %s332_s23, %s480_s4 }
  0x39   :  { %p338_p11 = pnand %p336_p10, %p333_p9 }
  0x3b   :  { %341 = shalt.err (!%p338_p11)
}
  0x3c   :  { %s342_s1 = scalar_lea.vmem %s44_s20, 512  ;;  %p347_p13 = scmp.lt.s32.totalorder %s44_s20, %s44_s20 }
  0x3d   :  { %p343_p12 = scmp.ne.s32.totalorder %s44_s20, %s342_s1  ;;  %p348_p0 = scmp.lt.s32.totalorder %s342_s1, %s342_s1 }
  0x3f   :  { %p349_p1 = por %p348_p0, %p347_p13 }
  0x41   :  { %p350_p2 = pnand %p349_p1, %p343_p12 }
  0x43   :  { %353 = shalt.err (!%p350_p2)
}
  0x44   :  { %49 = dma.hbm_to_vmem [thread:$0]  %s480_s4, 512, %s44_s20, [#allocation12], %s364_s15, %s364_s15, %s365_s16  }
  0x45   :  { %356 = dma.done.wait [#allocation10], 256  }
  0x46   :  { %357 = vsyncadd [#allocation10], 4294967040 }
  0x47   :  { %358 = dma.done.wait [#allocation12], 512  }
  0x48   :  { %359 = vsyncadd [#allocation12], 4294966784  ;;  %s57_s28 = sld [smem:[#allocation6]]  ;;  %s240_s6 = sld [smem:[#allocation6 + $0x1]]  ;;  %vm60_vm0 = vcmask 253952   ;;  %vm166_vm1 = vcmask 261120   ;;  %v185_v53 = vlaneseq }
  0x49   :  { %s62_s29 = sld [smem:[#allocation7]]  ;;  %s241_s7 = sld [smem:[#allocation7 + $0x1]]  ;;  %vm191_vm3 = vcmask 7168  }
  0x4a   :  { %s66_s30 = sld [smem:[#allocation8]]  ;;  %s242_s8 = sld [smem:[#allocation8 + $0x1]]  ;;  %v186_v54 = vshrl.u32 %v185_v53, 7  ;;  %v203_v55 = vand.u32 127, %v185_v53 }
  0x4b   :  { %s243_s2 = sld [smem:[#allocation6 + $0x2]]  ;;  %s432_s11 = sld [smem:[#allocation6 + $0x3]] }
  0x4c   :  { %s244_s9 = sld [smem:[#allocation7 + $0x2]]  ;;  %s434_s12 = sld [smem:[#allocation7 + $0x3]]  ;;  %vm204_vm4 = vcmp.eq.s32.totalorder %v186_v54, 0  ;;  %vm205_vm5 = vcmp.eq.s32.totalorder %v203_v55, 0 }
  0x4d   :  { %s430_s10 = sld [smem:[#allocation8 + $0x2]]  ;;  %s436_s4 = sld [smem:[#allocation8 + $0x3]]  ;;  %vm206_vm6 = vmand %vm204_vm4, %vm205_vm5 }
  0x4e   :  { %s58_s13 = scalar_lea.vmem [#allocation9], %s57_s28  ;;  %s72_s16 = scalar_lea.vmem [#allocation9], %s240_s6 }
  0x4f   :  { %v59_v0 = vld [vmem:[%s58_s13] sm:$0x1]  ;;  %s63_s14 = scalar_lea.vmem [#allocation11], %s62_s29  ;;  %s76_s17 = scalar_lea.vmem [#allocation11], %s241_s7 }
  0x50   :  { %v64_v1 = vld [vmem:[%s63_s14] sm:$0x1]  ;;  %61 = vst.msk [vmem:[#allocation2] sm:$0x1] %vm60_vm0, %v59_v0  ;;  %s67_s15 = scalar_lea.vmem [#allocation11], %s66_s30  ;;  %s80_s18 = scalar_lea.vmem [#allocation11], %s242_s8 }
  0x51   :  { %65 = vst.msk [vmem:[#allocation3] sm:$0x1] %vm60_vm0, %v64_v1  ;;  %v68_v2 = vld [vmem:[%s67_s15] sm:$0x1]  ;;  %s85_s19 = scalar_lea.vmem [#allocation9], %s243_s2  ;;  %s98_s22 = scalar_lea.vmem [#allocation9], %s432_s11 }
  0x52   :  { %v73_v3 = vld [vmem:[%s72_s16] sm:$0x1]  ;;  %69 = vst.msk [vmem:[#allocation4] sm:$0x1] %vm60_vm0, %v68_v2  ;;  %s89_s20 = scalar_lea.vmem [#allocation11], %s244_s9  ;;  %s102_s23 = scalar_lea.vmem [#allocation11], %s434_s12 }
  0x53   :  { %74 = vst.msk [vmem:[#allocation2 + $0x1] sm:$0x1] %vm60_vm0, %v73_v3  ;;  %v77_v4 = vld [vmem:[%s76_s17] sm:$0x1]  ;;  %s93_s21 = scalar_lea.vmem [#allocation11], %s430_s10  ;;  %s106_s24 = scalar_lea.vmem [#allocation11], %s436_s4 }
  0x54   :  { %v81_v5 = vld [vmem:[%s80_s18] sm:$0x1]  ;;  %78 = vst.msk [vmem:[#allocation3 + $0x1] sm:$0x1] %vm60_vm0, %v77_v4  ;;  %s249_s25 = sld [smem:[#allocation6 + $0x4]]  ;;  %s252_s1 = sld [smem:[#allocation6 + $0x5]] }
  0x55   :  { %82 = vst.msk [vmem:[#allocation4 + $0x1] sm:$0x1] %vm60_vm0, %v81_v5  ;;  %v86_v6 = vld [vmem:[%s85_s19] sm:$0x1]  ;;  %s250_s26 = sld [smem:[#allocation7 + $0x4]]  ;;  %s253_s3 = sld [smem:[#allocation7 + $0x5]] }
  0x56   :  { %v90_v7 = vld [vmem:[%s89_s20] sm:$0x1]  ;;  %87 = vst.msk [vmem:[#allocation2 + $0x2] sm:$0x1] %vm60_vm0, %v86_v6  ;;  %s251_s0 = sld [smem:[#allocation8 + $0x4]]  ;;  %s254_s27 = sld [smem:[#allocation8 + $0x5]] }
  0x57   :  { %91 = vst.msk [vmem:[#allocation3 + $0x2] sm:$0x1] %vm60_vm0, %v90_v7  ;;  %v94_v8 = vld [vmem:[%s93_s21] sm:$0x1]  ;;  %s255_s28 = sld [smem:[#allocation6 + $0x6]]  ;;  %s454_s6 = sld [smem:[#allocation6 + $0x7]] }
  0x58   :  { %v99_v9 = vld [vmem:[%s98_s22] sm:$0x1]  ;;  %95 = vst.msk [vmem:[#allocation4 + $0x2] sm:$0x1] %vm60_vm0, %v94_v8  ;;  %s256_s29 = sld [smem:[#allocation7 + $0x6]]  ;;  %s456_s7 = sld [smem:[#allocation7 + $0x7]] }
  0x59   :  { %100 = vst.msk [vmem:[#allocation2 + $0x3] sm:$0x1] %vm60_vm0, %v99_v9  ;;  %v103_v10 = vld [vmem:[%s102_s23] sm:$0x1]  ;;  %s257_s30 = sld [smem:[#allocation8 + $0x6]]  ;;  %s458_s8 = sld [smem:[#allocation8 + $0x7]] }
  0x5a   :  { %v107_v11 = vld [vmem:[%s106_s24] sm:$0x1]  ;;  %104 = vst.msk [vmem:[#allocation3 + $0x3] sm:$0x1] %vm60_vm0, %v103_v10  ;;  %s111_s2 = scalar_lea.vmem [#allocation9], %s249_s25  ;;  %s124_s11 = scalar_lea.vmem [#allocation9], %s252_s1 }
  0x5b   :  { %108 = vst.msk [vmem:[#allocation4 + $0x3] sm:$0x1] %vm60_vm0, %v107_v11  ;;  %v112_v12 = vld [vmem:[%s111_s2] sm:$0x1]  ;;  %s115_s9 = scalar_lea.vmem [#allocation11], %s250_s26  ;;  %s128_s12 = scalar_lea.vmem [#allocation11], %s253_s3 }
  0x5c   :  { %113 = vst.msk [vmem:[#allocation2 + $0x4] sm:$0x1] %vm60_vm0, %v112_v12  ;;  %v116_v13 = vld [vmem:[%s115_s9] sm:$0x1]  ;;  %s119_s10 = scalar_lea.vmem [#allocation11], %s251_s0  ;;  %s132_s4 = scalar_lea.vmem [#allocation11], %s254_s27 }
  0x5d   :  { %v120_v14 = vld [vmem:[%s119_s10] sm:$0x1]  ;;  %117 = vst.msk [vmem:[#allocation3 + $0x4] sm:$0x1] %vm60_vm0, %v116_v13  ;;  %s137_s13 = scalar_lea.vmem [#allocation9], %s255_s28  ;;  %s150_s16 = scalar_lea.vmem [#allocation9], %s454_s6 }
  0x5e   :  { %121 = vst.msk [vmem:[#allocation4 + $0x4] sm:$0x1] %vm60_vm0, %v120_v14  ;;  %v125_v15 = vld [vmem:[%s124_s11] sm:$0x1]  ;;  %s141_s14 = scalar_lea.vmem [#allocation11], %s256_s29  ;;  %s154_s17 = scalar_lea.vmem [#allocation11], %s456_s7 }
  0x5f   :  { %v129_v16 = vld [vmem:[%s128_s12] sm:$0x1]  ;;  %126 = vst.msk [vmem:[#allocation2 + $0x5] sm:$0x1] %vm60_vm0, %v125_v15  ;;  %s145_s15 = scalar_lea.vmem [#allocation11], %s257_s30  ;;  %s158_s18 = scalar_lea.vmem [#allocation11], %s458_s8 }
  0x60   :  { %130 = vst.msk [vmem:[#allocation3 + $0x5] sm:$0x1] %vm60_vm0, %v129_v16  ;;  %v133_v17 = vld [vmem:[%s132_s4] sm:$0x1] }
  0x61   :  { %v138_v18 = vld [vmem:[%s137_s13] sm:$0x1]  ;;  %134 = vst.msk [vmem:[#allocation4 + $0x5] sm:$0x1] %vm60_vm0, %v133_v17 }
  0x62   :  { %139 = vst.msk [vmem:[#allocation2 + $0x6] sm:$0x1] %vm60_vm0, %v138_v18  ;;  %v142_v19 = vld [vmem:[%s141_s14] sm:$0x1] }
  0x63   :  { %v146_v20 = vld [vmem:[%s145_s15] sm:$0x1]  ;;  %143 = vst.msk [vmem:[#allocation3 + $0x6] sm:$0x1] %vm60_vm0, %v142_v19 }
  0x64   :  { %147 = vst.msk [vmem:[#allocation4 + $0x6] sm:$0x1] %vm60_vm0, %v146_v20  ;;  %v151_v21 = vld [vmem:[%s150_s16] sm:$0x1] }
  0x65   :  { %v155_v22 = vld [vmem:[%s154_s17] sm:$0x1]  ;;  %152 = vst.msk [vmem:[#allocation2 + $0x7] sm:$0x1] %vm60_vm0, %v151_v21 }
  0x66   :  { %156 = vst.msk [vmem:[#allocation3 + $0x7] sm:$0x1] %vm60_vm0, %v155_v22  ;;  %v159_v23 = vld [vmem:[%s158_s18] sm:$0x1] }
  0x67   :  { %160 = vst.msk [vmem:[#allocation4 + $0x7] sm:$0x1] %vm60_vm0, %v159_v23 }
  0x6c   :  { %v161_v25 = vld [vmem:[#allocation2] sm:$0xff] }
  0x6d   :  { %v162_v24 = vld [vmem:[#allocation3] sm:$0xff] }
  0x6e   :  { %v163_v26 = vld [vmem:[#allocation4] sm:$0xff] }
  0x6f   :  { %v164_v27 = vsub.f32 %v162_v24, %v163_v26 }
  0x71   :  { %v165_v28 = vmul.f32 %v164_v27, %v161_v25 }
  0x73   :  { %v167_v29 = vsel %vm166_vm1, %v165_v28, 0.0 }
  0x74   :  { %168 = vadd.xlane.f32.xlu0 %v167_v29 }
 0x101   :  { %v169_v30 = vpop.xlane.xlu0 %168 }
 0x102   :  { %v171_v31 = vand.u32 2147483647, %v169_v30  ;;  %v170_v42 = vmin.f32 %v169_v30, 0.0 }
 0x104   :  { %v172_v32 = vsub.f32 0.0, %v171_v31 }
 0x106   :  { %v173_v33 = vmul.f32 1.442695, %v172_v32 }
 0x108   :  { %270 = vpow2.f32 %v173_v33 }
 0x112   :  { %v271_v34 = vpop.eup %270 }
 0x113   :  { %v175_v35 = vadd.f32 1.0, %v271_v34  ;;  %v178_v36 = vmul.f32 -0.5, %v271_v34  ;;  %v181_v38 = vand.u32 2147483647, %v271_v34 }
 0x115   :  { %272 = vlog2.f32 %v175_v35  ;;  %v179_v37 = vadd.f32 1.0, %v178_v36  ;;  %vm182_vm2 = vcmp.lt.f32.partialorder %v181_v38, 0.0004427343 }
 0x117   :  { %v180_v41 = vmul.f32 %v271_v34, %v179_v37 }
 0x11f   :  { %v273_v39 = vpop.eup %272 }
 0x120   :  { %v177_v40 = vmul.f32 0.6931472, %v273_v39 }
 0x122   :  { %v183_v43 = vsel %vm182_vm2, %v180_v41, %v177_v40 }
 0x123   :  { %v184_v44 = vsub.f32 %v170_v42, %v183_v43 }
 0x125   :  { %v192_v45 = vsel %vm191_vm3, %v184_v44, 0.0 }
 0x126   :  { %193 = vadd.xlane.f32.xlu0 %v192_v45 }
 0x1b3   :  { %v194_v46 = vpop.xlane.xlu0 %193 }
 0x1b4   :  { %v195_v47 = vrot.slane %v194_v46, 4 }
 0x1b6   :  { %v196_v48 = vadd.f32 %v195_v47, %v194_v46 }
 0x1b8   :  { %v197_v49 = vrot.slane %v196_v48, 2 }
 0x1ba   :  { %v198_v50 = vadd.f32 %v197_v49, %v196_v48 }
 0x1bc   :  { %v199_v51 = vrot.slane %v198_v50, 1 }
 0x1be   :  { %v200_v52 = vadd.f32 %v199_v51, %v198_v50 }
 0x1c0   :  { %261 = vpush %v200_v52 }
 0x1f1   :  { %s262_s19 = spop %261 }
 0x1f2   :  { %v207_v56 = vstv %s262_s19 }
 0x1f3   :  { %v208_v57 = vsel %vm206_vm6, %v207_v56, 0.0 }
 0x1f4   :  { %209 = vst [vmem:[%s481_s5] sm:$0xff] %v208_v57 }
 0x1f5   :  { %214 = vsyncpa [#allocation10], 1 }
 0x1f6   :  { %215 = vsyncpa [#allocation12], 1 }

</bundles_post_ra>
